<compile_context>
chip_gen: v7x
topology: tpu7x:2x2x1
jax: 0.10.0
libtpu: 0.0.40
codegen_flags: <defaults>
</compile_context>

<pallas_src>
import jax
import jax.numpy as jnp
from jax import lax
from jax.experimental import pallas as pl
from jax.experimental.pallas import tpu as pltpu

_LANES = 128


def _default_num_splits():
    # Only v7x has 2 TensorCores per chip; splitting the memory-bound reduction
    # buys nothing on v5e/v6e and only adds a second output writeback.
    try:
        kind = jax.devices()[0].device_kind.lower()
    except Exception:
        return 1
    return 2 if ("v7" in kind or "7x" in kind) else 1


def _tiled_sum(t2d, *, block_bytes, num_splits):
    """Partial f32 sums of a (n_rows, 128) array via a grid-accumulated reduction.

    Returns a (num_splits * acc_rows, 128) f32 array; caller does the tiny final sum.
    """
    n_rows = t2d.shape[0]
    itemsize = jnp.dtype(t2d.dtype).itemsize

    if num_splits is None:
        num_splits = _default_num_splits()

    # ---- tile geometry (static Python ints) ---------------------------------
    budget_rows = max(512, (block_bytes // (_LANES * itemsize)) // 512 * 512)
    if n_rows >= 512:
        tile_rows = min(budget_rows, (n_rows // 512) * 512)
    elif n_rows >= 8:
        tile_rows = (n_rows // 8) * 8
    else:
        tile_rows = n_rows
    # Accumulator slab: 64 rows => 8 independent (8,128) f32 add chains.
    acc_rows = tile_rows
    for cand in (64, 32, 16, 8):
        if tile_rows % cand == 0:
            acc_rows = cand
            break
    # Rows reduced per fori_loop step (bounds in-kernel temporaries to ~0.5 MiB).
    chunk_rows = acc_rows
    while chunk_rows * 2 <= min(1024, tile_rows) and tile_rows % (chunk_rows * 2) == 0:
        chunk_rows *= 2
    n_chunks = tile_rows // chunk_rows
    n_slabs = chunk_rows // acc_rows

    steps_total = pl.cdiv(n_rows, tile_rows)
    num_splits = max(1, min(num_splits, steps_total))
    steps_per_split = pl.cdiv(steps_total, num_splits)
    last_block = steps_total - 1

    def kernel(t_ref, acc_ref):
        c = pl.program_id(0)          # TensorCore split ("parallel")
        i = pl.program_id(1)          # reduction step   ("arbitrary")

        @pl.when(i == 0)
        def _init():
            acc_ref[...] = jnp.zeros_like(acc_ref)

        start = (c * steps_per_split + i) * tile_rows   # nominal first row of this tile
        valid = n_rows - start                          # #real rows in this tile

        def _reduce_chunk(k, row_iota):
            r0 = pl.multiple_of(k * chunk_rows, chunk_rows)
            t = t_ref[pl.ds(r0, chunk_rows), :].astype(jnp.float32)
            if row_iota is not None:
                # Boundary tile: rows >= valid hold garbage (Pallas does not
                # zero-fill boundary blocks) -> mask them out.
                t = jnp.where(row_iota + r0 < valid, t, 0.0)
            acc_ref[...] += jnp.sum(t.reshape(n_slabs, acc_rows, _LANES), axis=0)

        @pl.when(valid >= tile_rows)                    # interior tile: no mask
        def _full():
            def body(k, carry):
                _reduce_chunk(k, None)
                return carry
            lax.fori_loop(0, n_chunks, body, 0)

        @pl.when(jnp.logical_and(valid > 0, valid < tile_rows))   # boundary tile
        def _boundary():
            row_iota = lax.broadcasted_iota(jnp.int32, (chunk_rows, _LANES), 0)
            def body(k, carry):
                _reduce_chunk(k, row_iota)
                return carry
            lax.fori_loop(0, n_chunks, body, 0)
        # valid <= 0: over-allocated grid point of the last split (index clamped
        # below) -> contributes nothing.

    def in_index(c, i):
        # Clamp over-allocated grid points onto the last real block; the kernel
        # masks their contribution to zero.
        return (jnp.minimum(c * steps_per_split + i, last_block), 0)

    return pl.pallas_call(
        kernel,
        out_shape=jax.ShapeDtypeStruct((num_splits * acc_rows, _LANES), jnp.float32),
        grid_spec=pltpu.PrefetchScalarGridSpec(
            num_scalar_prefetch=0,
            grid=(num_splits, steps_per_split),
            in_specs=[pl.BlockSpec((tile_rows, _LANES), in_index)],
            out_specs=pl.BlockSpec((acc_rows, _LANES), lambda c, i: (c, 0)),
        ),
        compiler_params=pltpu.CompilerParams(
            dimension_semantics=("parallel", "arbitrary"),
            vmem_limit_bytes=32 * 1024 * 1024),
        cost_estimate=pl.CostEstimate(
            flops=n_rows * _LANES,
            transcendentals=0,
            bytes_accessed=n_rows * _LANES * itemsize
            + num_splits * acc_rows * _LANES * 4),
    )(t2d)


def binary_crossentropy(pred, target, *, block_bytes=8 * 1024 * 1024, num_splits=None):
    """pred: any array with exactly 2 elements; target: arbitrary-shape array."""
    pred = jnp.asarray(pred, jnp.float32).reshape(2)
    target = jnp.asarray(target)
    if target.dtype not in (jnp.float32, jnp.bfloat16):
        # Rare path (ints/bools/f64): one explicit cast; f32/bf16 stream natively.
        target = target.astype(jnp.float32)

    n = int(target.size)
    n_rows, rem = divmod(n, _LANES)
    t_flat = target.reshape(-1)                 # contiguous reshape: no copy

    total = jnp.float32(0.0)
    if n_rows > 0:
        # n % 128 == 0 (the common case): pure bitcast reshape, zero extra HBM traffic.
        # TODO(synk): for n % 128 != 0 the bulk slice below may cost one extra copy pass.
        t2d = t_flat[: n_rows * _LANES].reshape(n_rows, _LANES)
        partials = _tiled_sum(t2d, block_bytes=block_bytes, num_splits=num_splits)
        total = total + jnp.sum(partials)       # tiny (<= 64 KiB) final reduce
    if rem:
        total = total + jnp.sum(t_flat[n_rows * _LANES:].astype(jnp.float32))

    mean_t = total / jnp.float32(n)
    # TODO(synk): like the PyTorch reference, no clamp on p0 -> p0 in {0,1} gives inf/nan.
    log2_p = jnp.log2(pred[0])
    log2_q = jnp.log2(1.0 - pred[0])
    return -((log2_p - log2_q) * mean_t + log2_q)


def _reference(pred, target):
    pred = jnp.asarray(pred, jnp.float32).reshape(2)
    p0 = pred[0]
    return -jnp.mean(target * jnp.log2(p0) + (1.0 - target) * jnp.log2(1.0 - p0))


if __name__ == "__main__":
    key = jax.random.PRNGKey(0)
    k1, k2 = jax.random.split(key)

    # pred must have exactly 2 elements (module does pred.view(2)); keep it in (0,1)
    pred = jax.random.uniform(k1, (2,), jnp.float32, minval=0.05, maxval=0.95)
    # target: small NCHW-ish tensor of {0,1} labels
    target = (jax.random.uniform(k2, (2, 4, 16, 16), jnp.float32) > 0.5).astype(jnp.float32)

    loss = binary_crossentropy(pred, target)
    jax.block_until_ready(loss)

    ref = _reference(pred, target)
    assert jnp.allclose(loss, ref, rtol=1e-5, atol=1e-5), (loss, ref)

    print("KERNEL_OK")
</pallas_src>

<mosaic_0001>
module attributes {stable_mosaic.version = 11 : i64} {
  func.func @kernel(%arg0: i32, %arg1: i32, %arg2: memref<16x128xf32, #tpu.memory_space<vmem>>, %arg3: memref<16x128xf32, #tpu.memory_space<vmem>>) attributes {dimension_semantics = [#tpu.dimension_semantics<parallel>, #tpu.dimension_semantics<arbitrary>], iteration_bounds = array<i64: 1, 1>, scalar_prefetch = 0 : i64, scratch_operands = 0 : i64, tpu.core_type = #tpu.core_type<tc>, window_params = [{transform_indices = @transform_0, window_bounds = array<i64: 16, 128>}, {transform_indices = @transform_1, window_bounds = array<i64: 16, 128>}]} {
    %c0_i32 = arith.constant 0 : i32
    %0 = arith.cmpi eq, %arg1, %c0_i32 : i32
    %1 = arith.extui %0 : i1 to i32
    %c0_i32_0 = arith.constant 0 : i32
    %2 = arith.cmpi ne, %1, %c0_i32_0 : i32
    scf.if %2 {
      %cst = arith.constant 0.000000e+00 : f32
      %15 = vector.broadcast %cst : f32 to vector<16x128xf32>
      %c0 = arith.constant 0 : index
      %c0_7 = arith.constant 0 : index
      %16 = vector.load %arg3[%c0, %c0_7] : memref<16x128xf32, #tpu.memory_space<vmem>>, vector<16x128xf32>
      tpu.vector_store %arg3[%c0, %c0_7], %15 {strides = array<i32>} : memref<16x128xf32, #tpu.memory_space<vmem>>, vector<16x128xf32>,
    } else {
    }
    %c1_i32 = arith.constant 1 : i32
    %3 = arith.muli %arg0, %c1_i32 : i32
    %4 = arith.addi %3, %arg1 : i32
    %c16_i32 = arith.constant 16 : i32
    %5 = arith.muli %4, %c16_i32 : i32
    %c16_i32_1 = arith.constant 16 : i32
    %6 = arith.subi %c16_i32_1, %5 : i32
    %c16_i32_2 = arith.constant 16 : i32
    %7 = arith.cmpi sge, %6, %c16_i32_2 : i32
    %8 = arith.extui %7 : i1 to i32
    %c0_i32_3 = arith.constant 0 : i32
    %9 = arith.cmpi ne, %8, %c0_i32_3 : i32
    scf.if %9 {
      %c0_i32_7 = arith.constant 0 : i32
      %c16_i32_8 = arith.constant 16 : i32
      %15 = arith.muli %c0_i32_7, %c16_i32_8 : i32
      %16 = tpu.assume_multiple %15, 16 : i32
      %17 = arith.index_cast %16 : i32 to index
      %c0 = arith.constant 0 : index
      %18 = vector.load %arg2[%17, %c0] : memref<16x128xf32, #tpu.memory_space<vmem>>, vector<16x128xf32>
      %c0_9 = arith.constant 0 : index
      %c0_10 = arith.constant 0 : index
      %19 = vector.load %arg3[%c0_9, %c0_10] : memref<16x128xf32, #tpu.memory_space<vmem>>, vector<16x128xf32>
      %20 = vector.shape_cast %18 : vector<16x128xf32> to vector<1x16x128xf32>
      %cst = arith.constant dense<0.000000e+00> : vector<16x128xf32>
      %21 = vector.multi_reduction <add>, %20, %cst [0] : vector<1x16x128xf32> to vector<16x128xf32>
      %22 = arith.addf %19, %21 : vector<16x128xf32>
      %c0_11 = arith.constant 0 : index
      %c0_12 = arith.constant 0 : index
      %23 = vector.load %arg3[%c0_11, %c0_12] : memref<16x128xf32, #tpu.memory_space<vmem>>, vector<16x128xf32>
      tpu.vector_store %arg3[%c0_11, %c0_12], %22 {strides = array<i32>} : memref<16x128xf32, #tpu.memory_space<vmem>>, vector<16x128xf32>,
      %c1_i32_13 = arith.constant 1 : i32
    } else {
    }
    %c0_i32_4 = arith.constant 0 : i32
    %10 = arith.cmpi sgt, %6, %c0_i32_4 : i32
    %c16_i32_5 = arith.constant 16 : i32
    %11 = arith.cmpi slt, %6, %c16_i32_5 : i32
    %12 = arith.andi %10, %11 : i1
    %13 = arith.extui %12 : i1 to i32
    %c0_i32_6 = arith.constant 0 : i32
    %14 = arith.cmpi ne, %13, %c0_i32_6 : i32
    scf.if %14 {
      %15 = tpu.iota {dimensions = array<i32: 0>} : vector<16x128xi32>
      %c0_i32_7 = arith.constant 0 : i32
      %c16_i32_8 = arith.constant 16 : i32
      %16 = arith.muli %c0_i32_7, %c16_i32_8 : i32
      %17 = tpu.assume_multiple %16, 16 : i32
      %18 = arith.index_cast %17 : i32 to index
      %c0 = arith.constant 0 : index
      %19 = vector.load %arg2[%18, %c0] : memref<16x128xf32, #tpu.memory_space<vmem>>, vector<16x128xf32>
      %20 = vector.broadcast %17 : i32 to vector<16x128xi32>
      %21 = arith.addi %15, %20 : vector<16x128xi32>
      %22 = vector.broadcast %6 : i32 to vector<16x128xi32>
      %23 = arith.cmpi slt, %21, %22 : vector<16x128xi32>
      %cst = arith.constant 0.000000e+00 : f32
      %24 = vector.broadcast %cst : f32 to vector<16x128xf32>
      %25 = arith.select %23, %19, %24 : vector<16x128xi1>, vector<16x128xf32>
      %c0_9 = arith.constant 0 : index
      %c0_10 = arith.constant 0 : index
      %26 = vector.load %arg3[%c0_9, %c0_10] : memref<16x128xf32, #tpu.memory_space<vmem>>, vector<16x128xf32>
      %27 = vector.shape_cast %25 : vector<16x128xf32> to vector<1x16x128xf32>
      %cst_11 = arith.constant dense<0.000000e+00> : vector<16x128xf32>
      %28 = vector.multi_reduction <add>, %27, %cst_11 [0] : vector<1x16x128xf32> to vector<16x128xf32>
      %29 = arith.addf %26, %28 : vector<16x128xf32>
      %c0_12 = arith.constant 0 : index
      %c0_13 = arith.constant 0 : index
      %30 = vector.load %arg3[%c0_12, %c0_13] : memref<16x128xf32, #tpu.memory_space<vmem>>, vector<16x128xf32>
      tpu.vector_store %arg3[%c0_12, %c0_13], %29 {strides = array<i32>} : memref<16x128xf32, #tpu.memory_space<vmem>>, vector<16x128xf32>,
      %c1_i32_14 = arith.constant 1 : i32
    } else {
    }
    return
  }
  func.func @transform_0(%arg0: i32, %arg1: i32) -> (i32, i32) {
    %c1_i32 = arith.constant 1 : i32
    %0 = arith.muli %arg0, %c1_i32 : i32
    %1 = arith.addi %0, %arg1 : i32
    %c0_i32 = arith.constant 0 : i32
    %2 = arith.minsi %1, %c0_i32 : i32
    %c0_i32_0 = arith.constant 0 : i32
    %c0_i32_1 = arith.constant 0 : i32
    return %2, %c0_i32_0 : i32, i32
  }
  func.func @transform_1(%arg0: i32, %arg1: i32) -> (i32, i32) {
    %c0_i32 = arith.constant 0 : i32
    %c0_i32_0 = arith.constant 0 : i32
    return %arg0, %c0_i32 : i32, i32
  }
}

</mosaic_0001>

<bundles_post_ra>
// kernel: tpu_custom_call.1
= control target key start
LH: loop header
LB: loop body
LE: loop exit
PB: predicated region body
PF: predicated region fallthrough
CT: control target
= control target key end

     0   :  { %6 = vsyncpa [#allocation3], 0  ;;  %s193_s0 = inlined_call_operand.hbm [shape: f32[16,128], index: 0, kind: input, shape index: {}]   ;;  %s194_s1 = inlined_call_operand.hbm [shape: f32[16,128], index: 1, kind: output, shape index: {}]  }
   0x1   :  { %7 = vsyncpa [#allocation4], 0  ;;  %s155_s6 = smov [#allocation2]   ;;  %s107_s10 = scalar_lea.hbm %s193_s0, 256 }
   0x2   :  { %s19_s7 = sshll.u32 %s155_s6, 4  ;;  %p108_p0 = scmp.ne.s32.totalorder %s193_s0, %s107_s10  ;;  %s20_s7 = int_to_ptr.vmem [resolvable:$true] %s19_s7 }
   0x3   :  { %p111_p1 = scmp.lt.u32.totalorder %s107_s10, %s193_s0 }
   0x5   :  { %p113_p2 = pnand %p111_p1, %p108_p0 }
   0x7   :  { %116 = shalt.err (!%p113_p2)
}
   0x8   :  { %s117_s15 = scalar_lea.vmem %s20_s7, 256  ;;  %p122_p4 = scmp.lt.s32.totalorder %s20_s7, %s20_s7 }
   0x9   :  { %p118_p3 = scmp.ne.s32.totalorder %s20_s7, %s117_s15  ;;  %p123_p5 = scmp.lt.s32.totalorder %s117_s15, %s117_s15 }
   0xb   :  { %p124_p6 = por %p123_p5, %p122_p4 }
   0xd   :  { %p125_p7 = pnand %p124_p6, %p118_p3 }
   0xf   :  { %128 = shalt.err (!%p125_p7)
}
  0x10   :  { %s156_s16 = smov 128   ;;  %s157_s17 = smov 8  }
  0x11   :  { %25 = dma.hbm_to_vmem [thread:$0]  %s193_s0, 256, %s20_s7, [#allocation3], %s156_s16, %s156_s16, %s157_s17  }
  0x12   :  { %151 = dma.done.wait [#allocation3], 256  }
  0x13   :  { %152 = vsyncadd [#allocation3], 4294967040  ;;  %s158_s20 = smov [#allocation5]   ;;  %v46_v0 = vld [vmem:[#allocation2] sm:$0xff]  ;;  %v47_v1 = vld [vmem:[#allocation2 + $0x8] sm:$0xff] }
  0x14   :  { %s88_s21 = sshll.u32 %s158_s20, 4  ;;  %54 = vst [vmem:[#allocation5] sm:$0xff] %v46_v0  ;;  %55 = vst [vmem:[#allocation5 + $0x8] sm:$0xff] %v47_v1  ;;  %s89_s21 = int_to_ptr.vmem [resolvable:$true] %s88_s21 }
  0x15   :  { %s129_s22 = scalar_lea.vmem %s89_s21, 256  ;;  %p134_p9 = scmp.lt.s32.totalorder %s89_s21, %s89_s21 }
  0x16   :  { %p130_p8 = scmp.ne.s32.totalorder %s89_s21, %s129_s22  ;;  %p135_p10 = scmp.lt.s32.totalorder %s129_s22, %s129_s22 }
  0x18   :  { %p136_p11 = por %p135_p10, %p134_p9 }
  0x1a   :  { %p137_p12 = pnand %p136_p11, %p130_p8 }
  0x1c   :  { %140 = shalt.err (!%p137_p12)
}
  0x1d   :  { %s141_s0 = scalar_lea.hbm %s194_s1, 256 }
  0x1e   :  { %p142_p13 = scmp.ne.s32.totalorder %s194_s1, %s141_s0  ;;  %p145_p0 = scmp.lt.u32.totalorder %s141_s0, %s194_s1 }
  0x20   :  { %p147_p1 = pnand %p145_p0, %p142_p13 }
  0x22   :  { %150 = shalt.err (!%p147_p1)
}
  0x23   :  { %94 = dma.vmem_to_hbm [thread:$0]  %s89_s21, 256, %s194_s1, [#allocation4], %s156_s16, %s156_s16, %s157_s17  }
  0x24   :  { %153 = dma.done.wait [#allocation4], 256  }
  0x25   :  { %154 = vsyncadd [#allocation4], 4294967040 }
  0x26   :  { %98 = vsyncpa [#allocation3], 1 }
  0x27   :  { %99 = vsyncpa [#allocation4], 1 }

</bundles_post_ra>
